<compile_context>
chip_gen: v7x
topology: tpu7x:2x2x1
jax: 0.10.0
libtpu: 0.0.40
codegen_flags: <defaults>
</compile_context>

<pallas_src>
import functools
import math

import jax
import jax.numpy as jnp
from jax.experimental import pallas as pl
from jax.experimental.pallas import tpu as pltpu


# ---------------------------------------------------------------------------
# Tiling helper
# ---------------------------------------------------------------------------

def _choose_tile(dim, target, align):
    """Largest tile <= target that divides dim and is a multiple of align; else full dim."""
    if dim <= target:
        return dim
    t = target
    while t >= align:
        if dim % t == 0:
            return t
        t //= 2
    return dim


# ---------------------------------------------------------------------------
# Tiled matmul + bias (+ optional activation)      out = act(x @ w + b)
# ---------------------------------------------------------------------------

def _matmul_kernel(x_ref, w_ref, b_ref, o_ref, acc_ref, *, activation):
    k = pl.program_id(2)

    @pl.when(k == 0)
    def _():
        acc_ref[...] = jnp.zeros_like(acc_ref)

    acc_ref[...] += jnp.dot(x_ref[...], w_ref[...],
                            preferred_element_type=jnp.float32)

    @pl.when(k == pl.num_programs(2) - 1)
    def _():
        y = acc_ref[...] + b_ref[...].astype(jnp.float32)
        if activation == "gelu":
            # TODO(synk): HF BERT uses exact (erf) GELU; tanh approximation used here.
            y = jax.nn.gelu(y, approximate=True)
        elif activation == "tanh":
            y = jnp.tanh(y)
        o_ref[...] = y.astype(o_ref.dtype)


def pallas_linear(x, w, b, activation=None, out_dtype=None,
                  tm_target=256, tn_target=256, tk_target=512):
    M, K = x.shape
    N = w.shape[1]
    out_dtype = out_dtype if out_dtype is not None else x.dtype
    tm = _choose_tile(M, tm_target, 8)
    tn = _choose_tile(N, tn_target, 128)
    tk = _choose_tile(K, tk_target, 128)
    grid = (M // tm, N // tn, K // tk)
    kern = functools.partial(_matmul_kernel, activation=activation)
    return pl.pallas_call(
        kern,
        out_shape=jax.ShapeDtypeStruct((M, N), out_dtype),
        grid_spec=pltpu.PrefetchScalarGridSpec(
            num_scalar_prefetch=0,
            grid=grid,
            in_specs=[pl.BlockSpec((tm, tk), lambda i, j, k: (i, k)),
                      pl.BlockSpec((tk, tn), lambda i, j, k: (k, j)),
                      pl.BlockSpec((1, tn), lambda i, j, k: (0, j))],
            out_specs=pl.BlockSpec((tm, tn), lambda i, j, k: (i, j)),
            scratch_shapes=[pltpu.VMEM((tm, tn), jnp.float32)]),
        compiler_params=pltpu.CompilerParams(
            dimension_semantics=("parallel", "parallel", "arbitrary")),
    )(x, w, b.reshape(1, N))


# ---------------------------------------------------------------------------
# Tiled matmul + bias + residual-add + LayerNorm epilogue
#   out = LayerNorm(x @ w + b + residual) * gamma + beta        (LN over full N = H)
# ---------------------------------------------------------------------------

def _matmul_add_ln_kernel(x_ref, w_ref, b_ref, r_ref, g_ref, bt_ref,
                          o_ref, acc_ref, *, eps):
    k = pl.program_id(1)

    @pl.when(k == 0)
    def _():
        acc_ref[...] = jnp.zeros_like(acc_ref)

    acc_ref[...] += jnp.dot(x_ref[...], w_ref[...],
                            preferred_element_type=jnp.float32)

    @pl.when(k == pl.num_programs(1) - 1)
    def _():
        y = (acc_ref[...] + b_ref[...].astype(jnp.float32)
             + r_ref[...].astype(jnp.float32))
        mu = jnp.mean(y, axis=-1, keepdims=True)
        var = jnp.mean(jnp.square(y - mu), axis=-1, keepdims=True)
        y = (y - mu) * jax.lax.rsqrt(var + eps)
        o_ref[...] = (y * g_ref[...].astype(jnp.float32)
                      + bt_ref[...].astype(jnp.float32)).astype(o_ref.dtype)


def pallas_linear_add_layernorm(x, w, b, residual, gamma, beta, eps=1e-12,
                                out_dtype=None, tm_target=256, tk_target=512):
    M, K = x.shape
    N = w.shape[1]                       # full N kept resident: LN reduces over N
    out_dtype = out_dtype if out_dtype is not None else residual.dtype
    tm = _choose_tile(M, tm_target, 8)
    tk = _choose_tile(K, tk_target, 128)
    grid = (M // tm, K // tk)
    kern = functools.partial(_matmul_add_ln_kernel, eps=eps)
    return pl.pallas_call(
        kern,
        out_shape=jax.ShapeDtypeStruct((M, N), out_dtype),
        grid_spec=pltpu.PrefetchScalarGridSpec(
            num_scalar_prefetch=0,
            grid=grid,
            in_specs=[pl.BlockSpec((tm, tk), lambda i, k: (i, k)),
                      pl.BlockSpec((tk, N), lambda i, k: (k, 0)),
                      pl.BlockSpec((1, N), lambda i, k: (0, 0)),
                      pl.BlockSpec((tm, N), lambda i, k: (i, 0)),
                      pl.BlockSpec((1, N), lambda i, k: (0, 0)),
                      pl.BlockSpec((1, N), lambda i, k: (0, 0))],
            out_specs=pl.BlockSpec((tm, N), lambda i, k: (i, 0)),
            scratch_shapes=[pltpu.VMEM((tm, N), jnp.float32)]),
        compiler_params=pltpu.CompilerParams(
            dimension_semantics=("parallel", "arbitrary")),
    )(x, w, b.reshape(1, N), residual, gamma.reshape(1, N), beta.reshape(1, N))


# ---------------------------------------------------------------------------
# Standalone LayerNorm (embeddings) — tiled over rows, no residual input
# ---------------------------------------------------------------------------

def _ln_kernel(x_ref, g_ref, b_ref, o_ref, *, eps):
    x = x_ref[...].astype(jnp.float32)
    mu = jnp.mean(x, axis=-1, keepdims=True)
    var = jnp.mean(jnp.square(x - mu), axis=-1, keepdims=True)
    y = (x - mu) * jax.lax.rsqrt(var + eps)
    o_ref[...] = (y * g_ref[...].astype(jnp.float32)
                  + b_ref[...].astype(jnp.float32)).astype(o_ref.dtype)


def pallas_layernorm(x, gamma, beta, eps=1e-12, out_dtype=None, tm_target=512):
    M, H = x.shape
    out_dtype = out_dtype if out_dtype is not None else x.dtype
    tm = _choose_tile(M, tm_target, 8)
    kern = functools.partial(_ln_kernel, eps=eps)
    return pl.pallas_call(
        kern,
        out_shape=jax.ShapeDtypeStruct((M, H), out_dtype),
        grid=(M // tm,),
        in_specs=[pl.BlockSpec((tm, H), lambda i: (i, 0)),
                  pl.BlockSpec((1, H), lambda i: (0, 0)),
                  pl.BlockSpec((1, H), lambda i: (0, 0))],
        out_specs=pl.BlockSpec((tm, H), lambda i: (i, 0)),
        compiler_params=pltpu.CompilerParams(
            dimension_semantics=("parallel",)),
    )(x, gamma.reshape(1, H), beta.reshape(1, H))


# ---------------------------------------------------------------------------
# Self-attention: fused QKV [B, S, 3H] in, lane-dense context [B, S, H] out.
# Q is pre-scaled by 1/sqrt(DH) (folded into the QKV projection weights).
# ---------------------------------------------------------------------------

def _attn_kernel(qkv_ref, m_ref, o_ref, *, num_heads, head_dim):
    H = num_heads * head_dim
    qkv = qkv_ref[0]                     # [S, 3H] bf16 (value, not ref — static slices below)
    mask = m_ref[0]                      # [1, S]  f32 additive bias, bcast over query rows
    ctx_heads = []
    for h in range(num_heads):           # static loop over heads; MXU fed per head
        q = qkv[:, h * head_dim:(h + 1) * head_dim]                  # [S, DH]
        k = qkv[:, H + h * head_dim:H + (h + 1) * head_dim]          # [S, DH]
        v = qkv[:, 2 * H + h * head_dim:2 * H + (h + 1) * head_dim]  # [S, DH]
        # scores = q @ k^T (contraction over DH, no explicit transpose)
        s = jax.lax.dot_general(q, k, (((1,), (1,)), ((), ())),
                                preferred_element_type=jnp.float32)  # [S, S] f32
        s = s + mask
        s_max = jnp.max(s, axis=-1, keepdims=True)
        p = jnp.exp(s - s_max)
        inv_denom = pl.reciprocal(jnp.sum(p, axis=-1, keepdims=True), approx=True)
        p = p * inv_denom
        ctx = jnp.dot(p.astype(v.dtype), v,
                      preferred_element_type=jnp.float32)            # [S, DH] f32
        ctx_heads.append(ctx)
    # single lane-dense write of the full [S, H] context block
    o_ref[0] = jnp.concatenate(ctx_heads, axis=-1).astype(o_ref.dtype)
    # TODO(synk): for long sequences, add a KV-block inner grid axis (flash-style online
    # softmax) instead of materializing the full [S, S] score matrix per head.


def pallas_attention(qkv, mask_bias, num_heads, head_dim):
    B, S, three_h = qkv.shape
    H = num_heads * head_dim
    kern = functools.partial(_attn_kernel, num_heads=num_heads, head_dim=head_dim)
    return pl.pallas_call(
        kern,
        out_shape=jax.ShapeDtypeStruct((B, S, H), qkv.dtype),
        grid=(B,),
        in_specs=[pl.BlockSpec((1, S, three_h), lambda b: (b, 0, 0)),
                  pl.BlockSpec((1, 1, S), lambda b: (b, 0, 0))],
        out_specs=pl.BlockSpec((1, S, H), lambda b: (b, 0, 0)),
        compiler_params=pltpu.CompilerParams(
            dimension_semantics=("parallel",)),
    )(qkv, mask_bias)


# ---------------------------------------------------------------------------
# Deterministic synthetic BERT parameters
# ---------------------------------------------------------------------------

def init_bert_params(key, cfg):
    H, I = cfg["hidden"], cfg["intermediate"]
    std = 0.02
    keys = iter(jax.random.split(key, 64))

    def w(shape):
        return (std * jax.random.normal(next(keys), shape)).astype(jnp.float32)

    params = {
        "word_emb": w((cfg["vocab_size"], H)),
        "pos_emb": w((cfg["max_position"], H)),
        "type_emb": w((cfg["type_vocab"], H)),
        "emb_ln_g": jnp.ones((H,), jnp.float32),
        "emb_ln_b": jnp.zeros((H,), jnp.float32),
        "pool_w": w((H, H)),
        "pool_b": jnp.zeros((H,), jnp.float32),
        "layers": [],
    }
    for _ in range(cfg["num_layers"]):
        params["layers"].append({
            "q_w": w((H, H)), "q_b": jnp.zeros((H,), jnp.float32),
            "k_w": w((H, H)), "k_b": jnp.zeros((H,), jnp.float32),
            "v_w": w((H, H)), "v_b": jnp.zeros((H,), jnp.float32),
            "o_w": w((H, H)), "o_b": jnp.zeros((H,), jnp.float32),
            "ln1_g": jnp.ones((H,), jnp.float32), "ln1_b": jnp.zeros((H,), jnp.float32),
            "i_w": w((H, I)), "i_b": jnp.zeros((I,), jnp.float32),
            "f_w": w((I, H)), "f_b": jnp.zeros((H,), jnp.float32),
            "ln2_g": jnp.ones((H,), jnp.float32), "ln2_b": jnp.zeros((H,), jnp.float32),
        })
    return params


# ---------------------------------------------------------------------------
# Forward pass:  Bert_Linear_txt.forward(txt, mask) -> pooler output [B, H]
# ---------------------------------------------------------------------------

def bert_linear_txt_forward(params, input_ids, attention_mask, cfg):
    B, S = input_ids.shape
    H = cfg["hidden"]
    NH = cfg["num_heads"]
    DH = H // NH
    L = cfg["num_layers"]
    bf16 = jnp.bfloat16

    # --- embeddings (gather is XLA glue; LayerNorm is a Pallas kernel) ---
    we = jnp.take(params["word_emb"], input_ids, axis=0)          # [B, S, H]
    pe = params["pos_emb"][:S][None, :, :]                        # [1, S, H]
    te = params["type_emb"][0][None, None, :]                     # token_type_ids = 0
    emb = (we + pe + te).reshape(B * S, H)
    hidden = pallas_layernorm(emb, params["emb_ln_g"], params["emb_ln_b"],
                              out_dtype=bf16)                     # [B*S, H] bf16

    # extended attention mask -> additive bias, as in HF BERT
    mask_bias = ((1.0 - attention_mask.astype(jnp.float32)) * -10000.0).reshape(B, 1, S)
    scale = 1.0 / math.sqrt(DH)

    for li, layer in enumerate(params["layers"]):
        x2d = hidden                                              # [rows, H] bf16

        # fused QKV projection; 1/sqrt(DH) folded into the Q weights & bias
        w_qkv = jnp.concatenate([layer["q_w"] * scale, layer["k_w"], layer["v_w"]],
                                axis=1).astype(bf16)              # [H, 3H]
        b_qkv = jnp.concatenate([layer["q_b"] * scale, layer["k_b"], layer["v_b"]])
        qkv = pallas_linear(x2d, w_qkv, b_qkv)                    # [B*S, 3H] bf16

        ctx = pallas_attention(qkv.reshape(B, S, 3 * H), mask_bias, NH, DH)
        ctx2d = ctx.reshape(B * S, H)                             # [B*S, H] bf16

        # output projection + residual + LayerNorm fused in one kernel
        hidden = pallas_linear_add_layernorm(
            ctx2d, layer["o_w"].astype(bf16), layer["o_b"],
            x2d, layer["ln1_g"], layer["ln1_b"], out_dtype=bf16)

        if li == L - 1:
            # pooler only consumes position 0; FFN + LN2 are position-wise,
            # so the last layer's FFN runs on the CLS rows only.
            hidden = hidden.reshape(B, S, H)[:, 0, :]             # [B, H] bf16

        inter = pallas_linear(hidden, layer["i_w"].astype(bf16), layer["i_b"],
                              activation="gelu")                  # [rows, I] bf16
        hidden = pallas_linear_add_layernorm(
            inter, layer["f_w"].astype(bf16), layer["f_b"],
            hidden, layer["ln2_g"], layer["ln2_b"], out_dtype=bf16)

    cls = hidden                                                  # [B, H] (CLS rows already)
    pooled = pallas_linear(cls, params["pool_w"].astype(bf16), params["pool_b"],
                           activation="tanh", out_dtype=jnp.float32)
    return pooled                                                 # == txt[1] (pooler_output)


# ---------------------------------------------------------------------------

if __name__ == "__main__":
    cfg = dict(vocab_size=50, max_position=16, type_vocab=2,
               hidden=32, num_heads=2, intermediate=64, num_layers=2)

    key = jax.random.PRNGKey(0)
    k_params, k_ids = jax.random.split(key)
    params = init_bert_params(k_params, cfg)

    B, S = 2, 8
    input_ids = jax.random.randint(k_ids, (B, S), 0, cfg["vocab_size"], dtype=jnp.int32)
    # second example has two padding positions masked out
    attention_mask = jnp.array([[1, 1, 1, 1, 1, 1, 1, 1],
                                [1, 1, 1, 1, 1, 1, 0, 0]], dtype=jnp.int32)

    pooled = bert_linear_txt_forward(params, input_ids, attention_mask, cfg)
    pooled = jax.block_until_ready(pooled)
    assert pooled.shape == (B, cfg["hidden"])
    assert bool(jnp.all(jnp.isfinite(pooled)))
    print("KERNEL_OK")
</pallas_src>

<mosaic_0001>
module attributes {stable_mosaic.version = 11 : i64} {
  func.func @_ln_kernel(%arg0: i32, %arg1: memref<16x32xf32, #tpu.memory_space<vmem>>, %arg2: memref<1x32xf32, #tpu.memory_space<vmem>>, %arg3: memref<1x32xf32, #tpu.memory_space<vmem>>, %arg4: memref<16x32xbf16, #tpu.memory_space<vmem>>) attributes {dimension_semantics = [#tpu.dimension_semantics<parallel>], iteration_bounds = array<i64: 1>, scalar_prefetch = 0 : i64, scratch_operands = 0 : i64, tpu.core_type = #tpu.core_type<tc>, window_params = [{transform_indices = @transform_0, window_bounds = array<i64: 16, 32>}, {pipeline_mode = #tpu.pipeline_mode<synchronous>, transform_indices = @transform_1, window_bounds = array<i64: 1, 32>}, {pipeline_mode = #tpu.pipeline_mode<synchronous>, transform_indices = @transform_2, window_bounds = array<i64: 1, 32>}, {transform_indices = @transform_3, window_bounds = array<i64: 16, 32>}]} {
    %c0 = arith.constant 0 : index
    %c0_0 = arith.constant 0 : index
    %0 = vector.load %arg1[%c0, %c0_0] : memref<16x32xf32, #tpu.memory_space<vmem>>, vector<16x32xf32>
    %cst = arith.constant dense<0.000000e+00> : vector<16xf32>
    %1 = vector.multi_reduction <add>, %0, %cst [1] : vector<16x32xf32> to vector<16xf32>
    %2 = vector.shape_cast %1 : vector<16xf32> to vector<16x1xf32>
    %cst_1 = arith.constant 3.200000e+01 : f32
    %3 = vector.broadcast %cst_1 : f32 to vector<16x1xf32>
    %4 = arith.divf %2, %3 : vector<16x1xf32>
    %5 = vector.broadcast %4 : vector<16x1xf32> to vector<16x32xf32>
    %6 = arith.subf %0, %5 : vector<16x32xf32>
    %7 = arith.mulf %6, %6 : vector<16x32xf32>
    %cst_2 = arith.constant dense<0.000000e+00> : vector<16xf32>
    %8 = vector.multi_reduction <add>, %7, %cst_2 [1] : vector<16x32xf32> to vector<16xf32>
    %9 = vector.shape_cast %8 : vector<16xf32> to vector<16x1xf32>
    %cst_3 = arith.constant 3.200000e+01 : f32
    %10 = vector.broadcast %cst_3 : f32 to vector<16x1xf32>
    %11 = arith.divf %9, %10 : vector<16x1xf32>
    %12 = vector.broadcast %4 : vector<16x1xf32> to vector<16x32xf32>
    %13 = arith.subf %0, %12 : vector<16x32xf32>
    %cst_4 = arith.constant 9.99999996E-13 : f32
    %14 = vector.broadcast %cst_4 : f32 to vector<16x1xf32>
    %15 = arith.addf %11, %14 : vector<16x1xf32>
    %16 = math.rsqrt %15 : vector<16x1xf32>
    %17 = vector.broadcast %16 : vector<16x1xf32> to vector<16x32xf32>
    %18 = arith.mulf %13, %17 : vector<16x32xf32>
    %c0_5 = arith.constant 0 : index
    %c0_6 = arith.constant 0 : index
    %19 = vector.load %arg2[%c0_5, %c0_6] : memref<1x32xf32, #tpu.memory_space<vmem>>, vector<1x32xf32>
    %20 = vector.broadcast %19 : vector<1x32xf32> to vector<16x32xf32>
    %21 = arith.mulf %18, %20 : vector<16x32xf32>
    %c0_7 = arith.constant 0 : index
    %c0_8 = arith.constant 0 : index
    %22 = vector.load %arg3[%c0_7, %c0_8] : memref<1x32xf32, #tpu.memory_space<vmem>>, vector<1x32xf32>
    %23 = vector.broadcast %22 : vector<1x32xf32> to vector<16x32xf32>
    %24 = arith.addf %21, %23 : vector<16x32xf32>
    %25 = arith.truncf %24 : vector<16x32xf32> to vector<16x32xbf16>
    %c0_9 = arith.constant 0 : index
    %c0_10 = arith.constant 0 : index
    %26 = vector.load %arg4[%c0_9, %c0_10] : memref<16x32xbf16, #tpu.memory_space<vmem>>, vector<16x32xbf16>
    tpu.vector_store %arg4[%c0_9, %c0_10], %25 {strides = array<i32>} : memref<16x32xbf16, #tpu.memory_space<vmem>>, vector<16x32xbf16>,
    return
  }
  func.func @transform_0(%arg0: i32) -> (i32, i32) {
    %c0_i32 = arith.constant 0 : i32
    %c0_i32_0 = arith.constant 0 : i32
    return %arg0, %c0_i32 : i32, i32
  }
  func.func @transform_1(%arg0: i32) -> (i32, i32) {
    %c0_i32 = arith.constant 0 : i32
    %c0_i32_0 = arith.constant 0 : i32
    %c0_i32_1 = arith.constant 0 : i32
    return %c0_i32, %c0_i32_0 : i32, i32
  }
  func.func @transform_2(%arg0: i32) -> (i32, i32) {
    %c0_i32 = arith.constant 0 : i32
    %c0_i32_0 = arith.constant 0 : i32
    %c0_i32_1 = arith.constant 0 : i32
    return %c0_i32, %c0_i32_0 : i32, i32
  }
  func.func @transform_3(%arg0: i32) -> (i32, i32) {
    %c0_i32 = arith.constant 0 : i32
    %c0_i32_0 = arith.constant 0 : i32
    return %arg0, %c0_i32 : i32, i32
  }
}

</mosaic_0001>

<bundles_post_ra>
// kernel: tpu_custom_call.1
= control target key start
LH: loop header
LB: loop body
LE: loop exit
PB: predicated region body
PF: predicated region fallthrough
CT: control target
= control target key end

     0   :  { %8 = vsyncpa [#allocation3], 0  ;;  %s229_s0 = inlined_call_operand.hbm [shape: f32[16,32], index: 0, kind: input, shape index: {}]   ;;  %s230_s1 = inlined_call_operand.vmem [shape: f32[1,32], index: 1, kind: input, shape index: {}]   ;;  %s231_s2 = inlined_call_operand.vmem [shape: f32[1,32], index: 2, kind: input, shape index: {}]   ;;  %s232_s3 = inlined_call_operand.hbm [shape: bf16[16,32], index: 3, kind: output, shape index: {}]  }
   0x1   :  { %9 = vsyncpa [#allocation4], 0  ;;  %s169_s12 = smov [#allocation2]   ;;  %s121_s16 = scalar_lea.hbm %s229_s0, 256 }
   0x2   :  { %s15_s13 = sshll.u32 %s169_s12, 4  ;;  %p122_p0 = scmp.ne.s32.totalorder %s229_s0, %s121_s16  ;;  %s16_s13 = int_to_ptr.vmem [resolvable:$true] %s15_s13 }
   0x3   :  { %p125_p1 = scmp.lt.u32.totalorder %s121_s16, %s229_s0 }
   0x5   :  { %p127_p2 = pnand %p125_p1, %p122_p0 }
   0x7   :  { %130 = shalt.err (!%p127_p2)
}
   0x8   :  { %s131_s21 = scalar_lea.vmem %s16_s13, 256  ;;  %p136_p4 = scmp.lt.s32.totalorder %s16_s13, %s16_s13 }
   0x9   :  { %p132_p3 = scmp.ne.s32.totalorder %s16_s13, %s131_s21  ;;  %p137_p5 = scmp.lt.s32.totalorder %s131_s21, %s131_s21 }
   0xb   :  { %p138_p6 = por %p137_p5, %p136_p4 }
   0xd   :  { %p139_p7 = pnand %p138_p6, %p132_p3 }
   0xf   :  { %142 = shalt.err (!%p139_p7)
}
  0x10   :  { %s170_s22 = smov 128   ;;  %s171_s23 = smov 8  }
  0x11   :  { %21 = dma.hbm_to_vmem [thread:$0]  %s229_s0, 256, %s16_s13, [#allocation3], %s170_s22, %s170_s22, %s171_s23  }
  0x12   :  { %165 = dma.done.wait [#allocation3], 256  }
  0x13   :  { %166 = vsyncadd [#allocation3], 4294967040  ;;  %vm31_vm0 = vcmask 261120   ;;  %v29_v0 = vld [vmem:[#allocation2] sm:$0xff]  ;;  %v30_v1 = vld [vmem:[#allocation2 + $0x8] sm:$0xff]  ;;  %vm85_vm1 = vcmask 257024  }
  0x14   :  { %v32_v2 = vsel %vm31_vm0, %v29_v0, 0.0  ;;  %v35_v3 = vsel %vm31_vm0, %v30_v1, 0.0  ;;  %v105_v21 = vld [vmem:[%s230_s1] ss:$0 sm:$0xff]  ;;  %s172_s29 = smov [#allocation5]  }
  0x15   :  { %33 = vadd.xlane.f32.xlu0 %v32_v2  ;;  %v106_v23 = vld [vmem:[%s231_s2] ss:$0 sm:$0xff]  ;;  %s93_s30 = sshll.u32 %s172_s29, 4  ;;  %s94_s30 = int_to_ptr.vmem [resolvable:$true] %s93_s30 }
  0x16   :  { %s143_s1 = scalar_lea.vmem %s94_s30, 128  ;;  %p148_p9 = scmp.lt.s32.totalorder %s94_s30, %s94_s30 }
  0x17   :  { %p144_p8 = scmp.ne.s32.totalorder %s94_s30, %s143_s1  ;;  %p149_p10 = scmp.lt.s32.totalorder %s143_s1, %s143_s1 }
  0x19   :  { %36 = vadd.xlane.f32.xlu0 %v35_v3  ;;  %p150_p11 = por %p149_p10, %p148_p9 }
  0x1b   :  { %p151_p12 = pnand %p150_p11, %p144_p8 }
  0xa2   :  { %v34_v4 = vpop.xlane.xlu0 %33 }
  0xa3   :  { %v39_v5 = vmul.f32 0.03125, %v34_v4 }
  0xa5   :  { %v41_v6 = vsub.f32 %v29_v0, %v39_v5 }
  0xa6   :  { %v37_v7 = vpop.xlane.xlu0 %36 }
  0xa7   :  { %v40_v8 = vmul.f32 0.03125, %v37_v7  ;;  %v43_v9 = vmul.f32 %v41_v6, %v41_v6 }
  0xa9   :  { %v42_v10 = vsub.f32 %v30_v1, %v40_v8  ;;  %v45_v11 = vsel %vm31_vm0, %v43_v9, 0.0 }
  0xaa   :  { %46 = vadd.xlane.f32.xlu1 %v45_v11 }
  0xab   :  { %v44_v12 = vmul.f32 %v42_v10, %v42_v10 }
  0xad   :  { %v48_v13 = vsel %vm31_vm0, %v44_v12, 0.0 }
  0xae   :  { %49 = vadd.xlane.f32.xlu1 %v48_v13 }
 0x137   :  { %v47_v14 = vpop.xlane.xlu1 %46 }
 0x138   :  { %v51_v15 = vmul.f32 0.03125, %v47_v14 }
 0x13a   :  { %v53_v16 = vadd.f32 1e-12, %v51_v15 }
 0x13b   :  { %v50_v17 = vpop.xlane.xlu1 %49 }
 0x13c   :  { %117 = vrsqrt.f32 %v53_v16  ;;  %v52_v18 = vmul.f32 0.03125, %v50_v17 }
 0x13e   :  { %v54_v19 = vadd.f32 1e-12, %v52_v18 }
 0x140   :  { %119 = vrsqrt.f32 %v54_v19 }
 0x146   :  { %v118_v20 = vpop.eup %117 }
 0x147   :  { %v57_v22 = vmul.f32 %v118_v20, %v41_v6 }
 0x149   :  { %v66_v24 = vmul.f32 %v105_v21, %v57_v22 }
 0x14a   :  { %v120_v25 = vpop.eup %119 }
 0x14b   :  { %v58_v26 = vmul.f32 %v120_v25, %v42_v10  ;;  %v75_v27 = vadd.f32 %v106_v23, %v66_v24 }
 0x14d   :  { %v67_v28 = vmul.f32 %v105_v21, %v58_v26  ;;  %v109_v29 = vpack.c.bf16 %v75_v27, %v75_v27 }
 0x14f   :  { %v76_v30 = vadd.f32 %v106_v23, %v67_v28  ;;  %86 = vst.msk [vmem:[#allocation5] sm:$0xf] %vm85_vm1, %v109_v29 }
 0x151   :  { %v110_v31 = vpack.c.bf16 %v76_v30, %v76_v30 }
 0x153   :  { %87 = vst.msk [vmem:[#allocation5 + $0x4] sm:$0xf] %vm85_vm1, %v110_v31 }
 0x154   :  { %154 = shalt.err (!%p151_p12)
}
 0x155   :  { %s155_s5 = scalar_lea.hbm %s232_s3, 128 }
 0x156   :  { %p156_p13 = scmp.ne.s32.totalorder %s232_s3, %s155_s5  ;;  %p159_p0 = scmp.lt.u32.totalorder %s155_s5, %s232_s3 }
 0x158   :  { %p161_p1 = pnand %p159_p0, %p156_p13 }
 0x15a   :  { %164 = shalt.err (!%p161_p1)
}
 0x15b   :  { %s173_s10 = smov 64   ;;  %s174_s11 = smov 4  }
 0x15c   :  { %99 = dma.vmem_to_hbm [thread:$0]  %s94_s30, 128, %s232_s3, [#allocation4], %s173_s10, %s173_s10, %s174_s11  }
 0x15d   :  { %167 = dma.done.wait [#allocation4], 128  }
 0x15e   :  { %168 = vsyncadd [#allocation4], 4294967168 }
 0x15f   :  { %103 = vsyncpa [#allocation3], 1 }
 0x160   :  { %104 = vsyncpa [#allocation4], 1 }

</bundles_post_ra>
